<compile_context>
chip_gen: v7x
topology: tpu7x:2x2x1
jax: 0.10.0
libtpu: 0.0.40
codegen_flags: <defaults>
</compile_context>

<pallas_src>
import jax
import jax.numpy as jnp
from jax.experimental import pallas as pl
from jax.experimental.pallas import tpu as pltpu


def _inputs_kernel(x_ref, w_ref, b_ref, idx_ref, tabs_ref, o_ref):
    # x_ref:    (C, TN)       BN-applied numeric features, lane-dense tile
    # w_ref:    (R, C)        conv1d (kernel_size=1) weight
    # b_ref:    (R, 1)        conv1d bias
    # idx_ref:  (T, TN) int32 per-table embedding index for every column
    # tabs_ref: (T, R, Vpad)  transposed, vocab-padded embedding tables
    # o_ref:    (R, TN)
    y = jnp.dot(w_ref[...], x_ref[...],
                preferred_element_type=jnp.float32)        # MXU (R, TN)
    y = y + b_ref[...]                                     # (R,1) lane bcast

    idx = idx_ref[...]                                     # (T, TN) int32
    n_tables = tabs_ref.shape[0]
    vpad = tabs_ref.shape[2]
    for t in range(n_tables):                              # static unroll
        tab = tabs_ref[t]                                  # (R, Vpad)
        row = idx[t:t + 1, :]                              # (1, TN)
        for v in range(vpad):                              # tiny vocab
            mask = (row == v).astype(jnp.float32)          # (1, TN)
            y = y + mask * tab[:, v:v + 1]                 # -> (R, TN), exact
    o_ref[...] = y.astype(o_ref.dtype)


def _pick_tile_n(npad):
    # Largest lane-dense tile that divides npad, preferring >=2 grid steps
    # (keeps both v7x TensorCores busy). npad is always a multiple of 128.
    for t in (1024, 512, 256, 128):
        if npad % t == 0 and npad // t >= 2:
            return t
    return 128


def wave_net_inputs(num_feat, emb_feat, emb_seq_feat, *, bn_scale, bn_shift,
                    conv_w, conv_b, emb_tables, emb_seq_tables):
    """num_feat (B,C,L) f32, emb_feat (B,n_emb) i32, emb_seq_feat
    (B,n_emb_seq,L) i32  ->  (B, R, L) f32."""
    B, C, L = num_feat.shape
    R = conv_w.shape[0]
    N = B * L
    npad = pl.cdiv(N, 128) * 128
    tn = _pick_tile_n(npad)

    # --- wrapper-side layout plumbing (fused by XLA into one producer) ---
    # eval-mode BN + (B,C,L) -> (C, B*L) lane-dense slab, pad lanes to npad.
    xbn = num_feat * bn_scale[None, :, None] + bn_shift[None, :, None]
    x2d = jnp.transpose(xbn, (1, 0, 2)).reshape(C, N)
    x2d = jnp.pad(x2d, ((0, 0), (0, npad - N)))

    # Unified index rows: static-embedding indices repeated over L so they
    # share the sequence-embedding path (column j = b*L + l).
    tables = list(emb_tables) + list(emb_seq_tables)
    idx_rows = []
    for n in range(len(emb_tables)):
        idx_rows.append(jnp.repeat(emb_feat[:, n], L))
    for n in range(len(emb_seq_tables)):
        idx_rows.append(emb_seq_feat[:, n, :].reshape(-1))
    if not tables:  # degenerate config: keep kernel signature uniform
        tables = [jnp.zeros((1, R), jnp.float32)]
        idx_rows = [jnp.zeros((N,), jnp.int32)]
    n_tables = len(tables)
    idx = jnp.stack(idx_rows).astype(jnp.int32)            # (T, N)
    idx = jnp.pad(idx, ((0, 0), (0, npad - N)))            # pad cols -> 0

    vmax = max(t.shape[0] for t in tables)
    vpad = max(8, ((vmax + 7) // 8) * 8)
    tabs = jnp.stack([jnp.pad(t, ((0, vpad - t.shape[0]), (0, 0))).T
                      for t in tables])                    # (T, R, Vpad)
    bias = conv_b.reshape(R, 1)

    out2d = pl.pallas_call(
        _inputs_kernel,
        out_shape=jax.ShapeDtypeStruct((R, npad), jnp.float32),
        grid=(npad // tn,),
        in_specs=[
            pl.BlockSpec((C, tn), lambda j: (0, j)),            # x slab
            pl.BlockSpec((R, C), lambda j: (0, 0)),             # conv weight
            pl.BlockSpec((R, 1), lambda j: (0, 0)),             # conv bias
            pl.BlockSpec((n_tables, tn), lambda j: (0, j)),     # emb indices
            pl.BlockSpec((n_tables, R, vpad), lambda j: (0, 0, 0)),  # tables
        ],
        out_specs=pl.BlockSpec((R, tn), lambda j: (0, j)),
        compiler_params=pltpu.CompilerParams(
            dimension_semantics=("parallel",)),
    )(x2d, conv_w, bias, idx, tabs)

    # (R, B*L) -> (B, R, L)
    return jnp.transpose(out2d[:, :N].reshape(R, B, L), (1, 0, 2))


def reference_forward(num_feat, emb_feat, emb_seq_feat, *, bn_scale, bn_shift,
                      conv_w, conv_b, emb_tables, emb_seq_tables):
    """Plain-JAX mirror of the PyTorch module (eval-mode BN)."""
    xn = num_feat * bn_scale[None, :, None] + bn_shift[None, :, None]
    out = jnp.einsum("rc,bcl->brl", conv_w, xn) + conv_b[None, :, None]
    for n, tbl in enumerate(emb_tables):
        out = out + tbl[emb_feat[:, n]][:, :, None]
    for n, tbl in enumerate(emb_seq_tables):
        out = out + jnp.transpose(tbl[emb_seq_feat[:, n, :]], (0, 2, 1))
    return out


if __name__ == "__main__":
    # Module config (small, consistent with the PyTorch module)
    B = 2
    num_feat_count = 4            # C
    L = 8                         # sequence length
    residual_channels = 16        # R
    emb_size = [5, 7]
    emb_seq_size = [3]
    use_bn = True
    eps = 1e-5

    key = jax.random.PRNGKey(0)
    ks = jax.random.split(key, 12)

    # Inputs
    num_feat = jax.random.normal(ks[0], (B, num_feat_count, L), jnp.float32)
    emb_feat = jnp.stack(
        [jax.random.randint(ks[1 + n], (B,), 0, sz)
         for n, sz in enumerate(emb_size)], axis=1).astype(jnp.int32)
    emb_seq_feat = jnp.stack(
        [jax.random.randint(ks[4 + n], (B, L), 0, sz)
         for n, sz in enumerate(emb_seq_size)], axis=1).astype(jnp.int32)

    # Parameters (eval-mode BatchNorm running stats)
    gamma = jax.random.normal(ks[6], (num_feat_count,), jnp.float32) * 0.1 + 1.0
    beta = jax.random.normal(ks[7], (num_feat_count,), jnp.float32) * 0.1
    run_mean = jax.random.normal(ks[8], (num_feat_count,), jnp.float32) * 0.1
    run_var = jnp.abs(jax.random.normal(ks[9], (num_feat_count,), jnp.float32)) + 1.0
    if use_bn:
        bn_scale = gamma / jnp.sqrt(run_var + eps)
        bn_shift = beta - run_mean * bn_scale
    else:
        bn_scale = jnp.ones((num_feat_count,), jnp.float32)
        bn_shift = jnp.zeros((num_feat_count,), jnp.float32)

    # Conv1d(kernel_size=1): PyTorch weight (R, C, 1) -> (R, C)
    conv_w = jax.random.normal(ks[10], (residual_channels, num_feat_count),
                               jnp.float32) * 0.2
    conv_b = jax.random.normal(ks[11], (residual_channels,), jnp.float32) * 0.1

    # Embedding tables
    emb_tables = [
        jax.random.normal(jax.random.fold_in(key, 100 + n),
                          (sz, residual_channels), jnp.float32)
        for n, sz in enumerate(emb_size)
    ]
    emb_seq_tables = [
        jax.random.normal(jax.random.fold_in(key, 200 + n),
                          (sz, residual_channels), jnp.float32)
        for n, sz in enumerate(emb_seq_size)
    ]

    out = wave_net_inputs(
        num_feat, emb_feat, emb_seq_feat,
        bn_scale=bn_scale, bn_shift=bn_shift,
        conv_w=conv_w, conv_b=conv_b,
        emb_tables=emb_tables, emb_seq_tables=emb_seq_tables)
    out = jax.block_until_ready(out)

    ref = reference_forward(
        num_feat, emb_feat, emb_seq_feat,
        bn_scale=bn_scale, bn_shift=bn_shift,
        conv_w=conv_w, conv_b=conv_b,
        emb_tables=emb_tables, emb_seq_tables=emb_seq_tables)

    assert out.shape == (B, residual_channels, L)
    assert jnp.allclose(out, ref, atol=1e-4, rtol=1e-4)
    print("KERNEL_OK")
</pallas_src>

<mosaic_0001>
module attributes {stable_mosaic.version = 11 : i64} {
  func.func @_inputs_kernel(%arg0: i32, %arg1: memref<4x128xf32, #tpu.memory_space<vmem>>, %arg2: memref<16x4xf32, #tpu.memory_space<vmem>>, %arg3: memref<16x1xf32, #tpu.memory_space<vmem>>, %arg4: memref<3x128xi32, #tpu.memory_space<vmem>>, %arg5: memref<3x16x8xf32, #tpu.memory_space<vmem>>, %arg6: memref<16x128xf32, #tpu.memory_space<vmem>>) attributes {dimension_semantics = [#tpu.dimension_semantics<parallel>], iteration_bounds = array<i64: 1>, scalar_prefetch = 0 : i64, scratch_operands = 0 : i64, tpu.core_type = #tpu.core_type<tc>, window_params = [{transform_indices = @transform_0, window_bounds = array<i64: 4, 128>}, {pipeline_mode = #tpu.pipeline_mode<synchronous>, transform_indices = @transform_1, window_bounds = array<i64: 16, 4>}, {pipeline_mode = #tpu.pipeline_mode<synchronous>, transform_indices = @transform_2, window_bounds = array<i64: 16, 1>}, {transform_indices = @transform_3, window_bounds = array<i64: 3, 128>}, {pipeline_mode = #tpu.pipeline_mode<synchronous>, transform_indices = @transform_4, window_bounds = array<i64: 3, 16, 8>}, {transform_indices = @transform_5, window_bounds = array<i64: 16, 128>}]} {
    %c0 = arith.constant 0 : index
    %c0_0 = arith.constant 0 : index
    %0 = vector.load %arg2[%c0, %c0_0] : memref<16x4xf32, #tpu.memory_space<vmem>>, vector<16x4xf32>
    %c0_1 = arith.constant 0 : index
    %c0_2 = arith.constant 0 : index
    %1 = vector.load %arg1[%c0_1, %c0_2] : memref<4x128xf32, #tpu.memory_space<vmem>>, vector<4x128xf32>
    %cst = arith.constant dense<0.000000e+00> : vector<16x128xf32>
    %2 = tpu.matmul %0, %1, %cst {dimension_numbers = #tpu.dot_dimension_numbers<[1], [0], [0], [1], [0, 0, 1, 1], [], []>} : vector<16x4xf32>, vector<4x128xf32>, vector<16x128xf32> -> vector<16x128xf32>
    %c0_3 = arith.constant 0 : index
    %c0_4 = arith.constant 0 : index
    %3 = vector.load %arg3[%c0_3, %c0_4] : memref<16x1xf32, #tpu.memory_space<vmem>>, vector<16x1xf32>
    %4 = vector.broadcast %3 : vector<16x1xf32> to vector<16x128xf32>
    %5 = arith.addf %2, %4 : vector<16x128xf32>
    %c0_5 = arith.constant 0 : index
    %c0_6 = arith.constant 0 : index
    %6 = vector.load %arg4[%c0_5, %c0_6] : memref<3x128xi32, #tpu.memory_space<vmem>>, vector<3x128xi32>
    %c0_7 = arith.constant 0 : index
    %c0_8 = arith.constant 0 : index
    %c0_9 = arith.constant 0 : index
    %7 = vector.load %arg5[%c0_7, %c0_8, %c0_9] : memref<3x16x8xf32, #tpu.memory_space<vmem>>, vector<1x16x8xf32>
    %8 = vector.shape_cast %7 : vector<1x16x8xf32> to vector<16x8xf32>
    %9 = vector.extract_strided_slice %6 {offsets = [0, 0], sizes = [1, 128], strides = [1, 1]} : vector<3x128xi32> to vector<1x128xi32>
    %c0_i32 = arith.constant 0 : i32
    %10 = vector.broadcast %c0_i32 : i32 to vector<1x128xi32>
    %11 = arith.cmpi eq, %9, %10 : vector<1x128xi32>
    %12 = arith.extui %11 : vector<1x128xi1> to vector<1x128xi32>
    %13 = arith.sitofp %12 : vector<1x128xi32> to vector<1x128xf32>
    %14 = vector.extract_strided_slice %8 {offsets = [0, 0], sizes = [16, 1], strides = [1, 1]} : vector<16x8xf32> to vector<16x1xf32>
    %15 = vector.broadcast %13 : vector<1x128xf32> to vector<16x128xf32>
    %16 = vector.broadcast %14 : vector<16x1xf32> to vector<16x128xf32>
    %17 = arith.mulf %15, %16 : vector<16x128xf32>
    %18 = arith.addf %5, %17 : vector<16x128xf32>
    %c1_i32 = arith.constant 1 : i32
    %19 = vector.broadcast %c1_i32 : i32 to vector<1x128xi32>
    %20 = arith.cmpi eq, %9, %19 : vector<1x128xi32>
    %21 = arith.extui %20 : vector<1x128xi1> to vector<1x128xi32>
    %22 = arith.sitofp %21 : vector<1x128xi32> to vector<1x128xf32>
    %23 = vector.extract_strided_slice %8 {offsets = [0, 1], sizes = [16, 1], strides = [1, 1]} : vector<16x8xf32> to vector<16x1xf32>
    %24 = vector.broadcast %22 : vector<1x128xf32> to vector<16x128xf32>
    %25 = vector.broadcast %23 : vector<16x1xf32> to vector<16x128xf32>
    %26 = arith.mulf %24, %25 : vector<16x128xf32>
    %27 = arith.addf %18, %26 : vector<16x128xf32>
    %c2_i32 = arith.constant 2 : i32
    %28 = vector.broadcast %c2_i32 : i32 to vector<1x128xi32>
    %29 = arith.cmpi eq, %9, %28 : vector<1x128xi32>
    %30 = arith.extui %29 : vector<1x128xi1> to vector<1x128xi32>
    %31 = arith.sitofp %30 : vector<1x128xi32> to vector<1x128xf32>
    %32 = vector.extract_strided_slice %8 {offsets = [0, 2], sizes = [16, 1], strides = [1, 1]} : vector<16x8xf32> to vector<16x1xf32>
    %33 = vector.broadcast %31 : vector<1x128xf32> to vector<16x128xf32>
    %34 = vector.broadcast %32 : vector<16x1xf32> to vector<16x128xf32>
    %35 = arith.mulf %33, %34 : vector<16x128xf32>
    %36 = arith.addf %27, %35 : vector<16x128xf32>
    %c3_i32 = arith.constant 3 : i32
    %37 = vector.broadcast %c3_i32 : i32 to vector<1x128xi32>
    %38 = arith.cmpi eq, %9, %37 : vector<1x128xi32>
    %39 = arith.extui %38 : vector<1x128xi1> to vector<1x128xi32>
    %40 = arith.sitofp %39 : vector<1x128xi32> to vector<1x128xf32>
    %41 = vector.extract_strided_slice %8 {offsets = [0, 3], sizes = [16, 1], strides = [1, 1]} : vector<16x8xf32> to vector<16x1xf32>
    %42 = vector.broadcast %40 : vector<1x128xf32> to vector<16x128xf32>
    %43 = vector.broadcast %41 : vector<16x1xf32> to vector<16x128xf32>
    %44 = arith.mulf %42, %43 : vector<16x128xf32>
    %45 = arith.addf %36, %44 : vector<16x128xf32>
    %c4_i32 = arith.constant 4 : i32
    %46 = vector.broadcast %c4_i32 : i32 to vector<1x128xi32>
    %47 = arith.cmpi eq, %9, %46 : vector<1x128xi32>
    %48 = arith.extui %47 : vector<1x128xi1> to vector<1x128xi32>
    %49 = arith.sitofp %48 : vector<1x128xi32> to vector<1x128xf32>
    %50 = vector.extract_strided_slice %8 {offsets = [0, 4], sizes = [16, 1], strides = [1, 1]} : vector<16x8xf32> to vector<16x1xf32>
    %51 = vector.broadcast %49 : vector<1x128xf32> to vector<16x128xf32>
    %52 = vector.broadcast %50 : vector<16x1xf32> to vector<16x128xf32>
    %53 = arith.mulf %51, %52 : vector<16x128xf32>
    %54 = arith.addf %45, %53 : vector<16x128xf32>
    %c5_i32 = arith.constant 5 : i32
    %55 = vector.broadcast %c5_i32 : i32 to vector<1x128xi32>
    %56 = arith.cmpi eq, %9, %55 : vector<1x128xi32>
    %57 = arith.extui %56 : vector<1x128xi1> to vector<1x128xi32>
    %58 = arith.sitofp %57 : vector<1x128xi32> to vector<1x128xf32>
    %59 = vector.extract_strided_slice %8 {offsets = [0, 5], sizes = [16, 1], strides = [1, 1]} : vector<16x8xf32> to vector<16x1xf32>
    %60 = vector.broadcast %58 : vector<1x128xf32> to vector<16x128xf32>
    %61 = vector.broadcast %59 : vector<16x1xf32> to vector<16x128xf32>
    %62 = arith.mulf %60, %61 : vector<16x128xf32>
    %63 = arith.addf %54, %62 : vector<16x128xf32>
    %c6_i32 = arith.constant 6 : i32
    %64 = vector.broadcast %c6_i32 : i32 to vector<1x128xi32>
    %65 = arith.cmpi eq, %9, %64 : vector<1x128xi32>
    %66 = arith.extui %65 : vector<1x128xi1> to vector<1x128xi32>
    %67 = arith.sitofp %66 : vector<1x128xi32> to vector<1x128xf32>
    %68 = vector.extract_strided_slice %8 {offsets = [0, 6], sizes = [16, 1], strides = [1, 1]} : vector<16x8xf32> to vector<16x1xf32>
    %69 = vector.broadcast %67 : vector<1x128xf32> to vector<16x128xf32>
    %70 = vector.broadcast %68 : vector<16x1xf32> to vector<16x128xf32>
    %71 = arith.mulf %69, %70 : vector<16x128xf32>
    %72 = arith.addf %63, %71 : vector<16x128xf32>
    %c7_i32 = arith.constant 7 : i32
    %73 = vector.broadcast %c7_i32 : i32 to vector<1x128xi32>
    %74 = arith.cmpi eq, %9, %73 : vector<1x128xi32>
    %75 = arith.extui %74 : vector<1x128xi1> to vector<1x128xi32>
    %76 = arith.sitofp %75 : vector<1x128xi32> to vector<1x128xf32>
    %77 = vector.extract_strided_slice %8 {offsets = [0, 7], sizes = [16, 1], strides = [1, 1]} : vector<16x8xf32> to vector<16x1xf32>
    %78 = vector.broadcast %76 : vector<1x128xf32> to vector<16x128xf32>
    %79 = vector.broadcast %77 : vector<16x1xf32> to vector<16x128xf32>
    %80 = arith.mulf %78, %79 : vector<16x128xf32>
    %81 = arith.addf %72, %80 : vector<16x128xf32>
    %c1 = arith.constant 1 : index
    %c0_10 = arith.constant 0 : index
    %c0_11 = arith.constant 0 : index
    %82 = vector.load %arg5[%c1, %c0_10, %c0_11] : memref<3x16x8xf32, #tpu.memory_space<vmem>>, vector<1x16x8xf32>
    %83 = vector.shape_cast %82 : vector<1x16x8xf32> to vector<16x8xf32>
    %84 = vector.extract_strided_slice %6 {offsets = [1, 0], sizes = [1, 128], strides = [1, 1]} : vector<3x128xi32> to vector<1x128xi32>
    %c0_i32_12 = arith.constant 0 : i32
    %85 = vector.broadcast %c0_i32_12 : i32 to vector<1x128xi32>
    %86 = arith.cmpi eq, %84, %85 : vector<1x128xi32>
    %87 = arith.extui %86 : vector<1x128xi1> to vector<1x128xi32>
    %88 = arith.sitofp %87 : vector<1x128xi32> to vector<1x128xf32>
    %89 = vector.extract_strided_slice %83 {offsets = [0, 0], sizes = [16, 1], strides = [1, 1]} : vector<16x8xf32> to vector<16x1xf32>
    %90 = vector.broadcast %88 : vector<1x128xf32> to vector<16x128xf32>
    %91 = vector.broadcast %89 : vector<16x1xf32> to vector<16x128xf32>
    %92 = arith.mulf %90, %91 : vector<16x128xf32>
    %93 = arith.addf %81, %92 : vector<16x128xf32>
    %c1_i32_13 = arith.constant 1 : i32
    %94 = vector.broadcast %c1_i32_13 : i32 to vector<1x128xi32>
    %95 = arith.cmpi eq, %84, %94 : vector<1x128xi32>
    %96 = arith.extui %95 : vector<1x128xi1> to vector<1x128xi32>
    %97 = arith.sitofp %96 : vector<1x128xi32> to vector<1x128xf32>
    %98 = vector.extract_strided_slice %83 {offsets = [0, 1], sizes = [16, 1], strides = [1, 1]} : vector<16x8xf32> to vector<16x1xf32>
    %99 = vector.broadcast %97 : vector<1x128xf32> to vector<16x128xf32>
    %100 = vector.broadcast %98 : vector<16x1xf32> to vector<16x128xf32>
    %101 = arith.mulf %99, %100 : vector<16x128xf32>
    %102 = arith.addf %93, %101 : vector<16x128xf32>
    %c2_i32_14 = arith.constant 2 : i32
    %103 = vector.broadcast %c2_i32_14 : i32 to vector<1x128xi32>
    %104 = arith.cmpi eq, %84, %103 : vector<1x128xi32>
    %105 = arith.extui %104 : vector<1x128xi1> to vector<1x128xi32>
    %106 = arith.sitofp %105 : vector<1x128xi32> to vector<1x128xf32>
    %107 = vector.extract_strided_slice %83 {offsets = [0, 2], sizes = [16, 1], strides = [1, 1]} : vector<16x8xf32> to vector<16x1xf32>
    %108 = vector.broadcast %106 : vector<1x128xf32> to vector<16x128xf32>
    %109 = vector.broadcast %107 : vector<16x1xf32> to vector<16x128xf32>
    %110 = arith.mulf %108, %109 : vector<16x128xf32>
    %111 = arith.addf %102, %110 : vector<16x128xf32>
    %c3_i32_15 = arith.constant 3 : i32
    %112 = vector.broadcast %c3_i32_15 : i32 to vector<1x128xi32>
    %113 = arith.cmpi eq, %84, %112 : vector<1x128xi32>
    %114 = arith.extui %113 : vector<1x128xi1> to vector<1x128xi32>
    %115 = arith.sitofp %114 : vector<1x128xi32> to vector<1x128xf32>
    %116 = vector.extract_strided_slice %83 {offsets = [0, 3], sizes = [16, 1], strides = [1, 1]} : vector<16x8xf32> to vector<16x1xf32>
    %117 = vector.broadcast %115 : vector<1x128xf32> to vector<16x128xf32>
    %118 = vector.broadcast %116 : vector<16x1xf32> to vector<16x128xf32>
    %119 = arith.mulf %117, %118 : vector<16x128xf32>
    %120 = arith.addf %111, %119 : vector<16x128xf32>
    %c4_i32_16 = arith.constant 4 : i32
    %121 = vector.broadcast %c4_i32_16 : i32 to vector<1x128xi32>
    %122 = arith.cmpi eq, %84, %121 : vector<1x128xi32>
    %123 = arith.extui %122 : vector<1x128xi1> to vector<1x128xi32>
    %124 = arith.sitofp %123 : vector<1x128xi32> to vector<1x128xf32>
    %125 = vector.extract_strided_slice %83 {offsets = [0, 4], sizes = [16, 1], strides = [1, 1]} : vector<16x8xf32> to vector<16x1xf32>
    %126 = vector.broadcast %124 : vector<1x128xf32> to vector<16x128xf32>
    %127 = vector.broadcast %125 : vector<16x1xf32> to vector<16x128xf32>
    %128 = arith.mulf %126, %127 : vector<16x128xf32>
    %129 = arith.addf %120, %128 : vector<16x128xf32>
    %c5_i32_17 = arith.constant 5 : i32
    %130 = vector.broadcast %c5_i32_17 : i32 to vector<1x128xi32>
    %131 = arith.cmpi eq, %84, %130 : vector<1x128xi32>
    %132 = arith.extui %131 : vector<1x128xi1> to vector<1x128xi32>
    %133 = arith.sitofp %132 : vector<1x128xi32> to vector<1x128xf32>
    %134 = vector.extract_strided_slice %83 {offsets = [0, 5], sizes = [16, 1], strides = [1, 1]} : vector<16x8xf32> to vector<16x1xf32>
    %135 = vector.broadcast %133 : vector<1x128xf32> to vector<16x128xf32>
    %136 = vector.broadcast %134 : vector<16x1xf32> to vector<16x128xf32>
    %137 = arith.mulf %135, %136 : vector<16x128xf32>
    %138 = arith.addf %129, %137 : vector<16x128xf32>
    %c6_i32_18 = arith.constant 6 : i32
    %139 = vector.broadcast %c6_i32_18 : i32 to vector<1x128xi32>
    %140 = arith.cmpi eq, %84, %139 : vector<1x128xi32>
    %141 = arith.extui %140 : vector<1x128xi1> to vector<1x128xi32>
    %142 = arith.sitofp %141 : vector<1x128xi32> to vector<1x128xf32>
    %143 = vector.extract_strided_slice %83 {offsets = [0, 6], sizes = [16, 1], strides = [1, 1]} : vector<16x8xf32> to vector<16x1xf32>
    %144 = vector.broadcast %142 : vector<1x128xf32> to vector<16x128xf32>
    %145 = vector.broadcast %143 : vector<16x1xf32> to vector<16x128xf32>
    %146 = arith.mulf %144, %145 : vector<16x128xf32>
    %147 = arith.addf %138, %146 : vector<16x128xf32>
    %c7_i32_19 = arith.constant 7 : i32
    %148 = vector.broadcast %c7_i32_19 : i32 to vector<1x128xi32>
    %149 = arith.cmpi eq, %84, %148 : vector<1x128xi32>
    %150 = arith.extui %149 : vector<1x128xi1> to vector<1x128xi32>
    %151 = arith.sitofp %150 : vector<1x128xi32> to vector<1x128xf32>
    %152 = vector.extract_strided_slice %83 {offsets = [0, 7], sizes = [16, 1], strides = [1, 1]} : vector<16x8xf32> to vector<16x1xf32>
    %153 = vector.broadcast %151 : vector<1x128xf32> to vector<16x128xf32>
    %154 = vector.broadcast %152 : vector<16x1xf32> to vector<16x128xf32>
    %155 = arith.mulf %153, %154 : vector<16x128xf32>
    %156 = arith.addf %147, %155 : vector<16x128xf32>
    %c2 = arith.constant 2 : index
    %c0_20 = arith.constant 0 : index
    %c0_21 = arith.constant 0 : index
    %157 = vector.load %arg5[%c2, %c0_20, %c0_21] : memref<3x16x8xf32, #tpu.memory_space<vmem>>, vector<1x16x8xf32>
    %158 = vector.shape_cast %157 : vector<1x16x8xf32> to vector<16x8xf32>
    %159 = vector.extract_strided_slice %6 {offsets = [2, 0], sizes = [1, 128], strides = [1, 1]} : vector<3x128xi32> to vector<1x128xi32>
    %c0_i32_22 = arith.constant 0 : i32
    %160 = vector.broadcast %c0_i32_22 : i32 to vector<1x128xi32>
    %161 = arith.cmpi eq, %159, %160 : vector<1x128xi32>
    %162 = arith.extui %161 : vector<1x128xi1> to vector<1x128xi32>
    %163 = arith.sitofp %162 : vector<1x128xi32> to vector<1x128xf32>
    %164 = vector.extract_strided_slice %158 {offsets = [0, 0], sizes = [16, 1], strides = [1, 1]} : vector<16x8xf32> to vector<16x1xf32>
    %165 = vector.broadcast %163 : vector<1x128xf32> to vector<16x128xf32>
    %166 = vector.broadcast %164 : vector<16x1xf32> to vector<16x128xf32>
    %167 = arith.mulf %165, %166 : vector<16x128xf32>
    %168 = arith.addf %156, %167 : vector<16x128xf32>
    %c1_i32_23 = arith.constant 1 : i32
    %169 = vector.broadcast %c1_i32_23 : i32 to vector<1x128xi32>
    %170 = arith.cmpi eq, %159, %169 : vector<1x128xi32>
    %171 = arith.extui %170 : vector<1x128xi1> to vector<1x128xi32>
    %172 = arith.sitofp %171 : vector<1x128xi32> to vector<1x128xf32>
    %173 = vector.extract_strided_slice %158 {offsets = [0, 1], sizes = [16, 1], strides = [1, 1]} : vector<16x8xf32> to vector<16x1xf32>
    %174 = vector.broadcast %172 : vector<1x128xf32> to vector<16x128xf32>
    %175 = vector.broadcast %173 : vector<16x1xf32> to vector<16x128xf32>
    %176 = arith.mulf %174, %175 : vector<16x128xf32>
    %177 = arith.addf %168, %176 : vector<16x128xf32>
    %c2_i32_24 = arith.constant 2 : i32
    %178 = vector.broadcast %c2_i32_24 : i32 to vector<1x128xi32>
    %179 = arith.cmpi eq, %159, %178 : vector<1x128xi32>
    %180 = arith.extui %179 : vector<1x128xi1> to vector<1x128xi32>
    %181 = arith.sitofp %180 : vector<1x128xi32> to vector<1x128xf32>
    %182 = vector.extract_strided_slice %158 {offsets = [0, 2], sizes = [16, 1], strides = [1, 1]} : vector<16x8xf32> to vector<16x1xf32>
    %183 = vector.broadcast %181 : vector<1x128xf32> to vector<16x128xf32>
    %184 = vector.broadcast %182 : vector<16x1xf32> to vector<16x128xf32>
    %185 = arith.mulf %183, %184 : vector<16x128xf32>
    %186 = arith.addf %177, %185 : vector<16x128xf32>
    %c3_i32_25 = arith.constant 3 : i32
    %187 = vector.broadcast %c3_i32_25 : i32 to vector<1x128xi32>
    %188 = arith.cmpi eq, %159, %187 : vector<1x128xi32>
    %189 = arith.extui %188 : vector<1x128xi1> to vector<1x128xi32>
    %190 = arith.sitofp %189 : vector<1x128xi32> to vector<1x128xf32>
    %191 = vector.extract_strided_slice %158 {offsets = [0, 3], sizes = [16, 1], strides = [1, 1]} : vector<16x8xf32> to vector<16x1xf32>
    %192 = vector.broadcast %190 : vector<1x128xf32> to vector<16x128xf32>
    %193 = vector.broadcast %191 : vector<16x1xf32> to vector<16x128xf32>
    %194 = arith.mulf %192, %193 : vector<16x128xf32>
    %195 = arith.addf %186, %194 : vector<16x128xf32>
    %c4_i32_26 = arith.constant 4 : i32
    %196 = vector.broadcast %c4_i32_26 : i32 to vector<1x128xi32>
    %197 = arith.cmpi eq, %159, %196 : vector<1x128xi32>
    %198 = arith.extui %197 : vector<1x128xi1> to vector<1x128xi32>
    %199 = arith.sitofp %198 : vector<1x128xi32> to vector<1x128xf32>
    %200 = vector.extract_strided_slice %158 {offsets = [0, 4], sizes = [16, 1], strides = [1, 1]} : vector<16x8xf32> to vector<16x1xf32>
    %201 = vector.broadcast %199 : vector<1x128xf32> to vector<16x128xf32>
    %202 = vector.broadcast %200 : vector<16x1xf32> to vector<16x128xf32>
    %203 = arith.mulf %201, %202 : vector<16x128xf32>
    %204 = arith.addf %195, %203 : vector<16x128xf32>
    %c5_i32_27 = arith.constant 5 : i32
    %205 = vector.broadcast %c5_i32_27 : i32 to vector<1x128xi32>
    %206 = arith.cmpi eq, %159, %205 : vector<1x128xi32>
    %207 = arith.extui %206 : vector<1x128xi1> to vector<1x128xi32>
    %208 = arith.sitofp %207 : vector<1x128xi32> to vector<1x128xf32>
    %209 = vector.extract_strided_slice %158 {offsets = [0, 5], sizes = [16, 1], strides = [1, 1]} : vector<16x8xf32> to vector<16x1xf32>
    %210 = vector.broadcast %208 : vector<1x128xf32> to vector<16x128xf32>
    %211 = vector.broadcast %209 : vector<16x1xf32> to vector<16x128xf32>
    %212 = arith.mulf %210, %211 : vector<16x128xf32>
    %213 = arith.addf %204, %212 : vector<16x128xf32>
    %c6_i32_28 = arith.constant 6 : i32
    %214 = vector.broadcast %c6_i32_28 : i32 to vector<1x128xi32>
    %215 = arith.cmpi eq, %159, %214 : vector<1x128xi32>
    %216 = arith.extui %215 : vector<1x128xi1> to vector<1x128xi32>
    %217 = arith.sitofp %216 : vector<1x128xi32> to vector<1x128xf32>
    %218 = vector.extract_strided_slice %158 {offsets = [0, 6], sizes = [16, 1], strides = [1, 1]} : vector<16x8xf32> to vector<16x1xf32>
    %219 = vector.broadcast %217 : vector<1x128xf32> to vector<16x128xf32>
    %220 = vector.broadcast %218 : vector<16x1xf32> to vector<16x128xf32>
    %221 = arith.mulf %219, %220 : vector<16x128xf32>
    %222 = arith.addf %213, %221 : vector<16x128xf32>
    %c7_i32_29 = arith.constant 7 : i32
    %223 = vector.broadcast %c7_i32_29 : i32 to vector<1x128xi32>
    %224 = arith.cmpi eq, %159, %223 : vector<1x128xi32>
    %225 = arith.extui %224 : vector<1x128xi1> to vector<1x128xi32>
    %226 = arith.sitofp %225 : vector<1x128xi32> to vector<1x128xf32>
    %227 = vector.extract_strided_slice %158 {offsets = [0, 7], sizes = [16, 1], strides = [1, 1]} : vector<16x8xf32> to vector<16x1xf32>
    %228 = vector.broadcast %226 : vector<1x128xf32> to vector<16x128xf32>
    %229 = vector.broadcast %227 : vector<16x1xf32> to vector<16x128xf32>
    %230 = arith.mulf %228, %229 : vector<16x128xf32>
    %231 = arith.addf %222, %230 : vector<16x128xf32>
    %c0_30 = arith.constant 0 : index
    %c0_31 = arith.constant 0 : index
    %232 = vector.load %arg6[%c0_30, %c0_31] : memref<16x128xf32, #tpu.memory_space<vmem>>, vector<16x128xf32>
    tpu.vector_store %arg6[%c0_30, %c0_31], %231 {strides = array<i32>} : memref<16x128xf32, #tpu.memory_space<vmem>>, vector<16x128xf32>,
    return
  }
  func.func @transform_0(%arg0: i32) -> (i32, i32) {
    %c0_i32 = arith.constant 0 : i32
    %c0_i32_0 = arith.constant 0 : i32
    return %c0_i32, %arg0 : i32, i32
  }
  func.func @transform_1(%arg0: i32) -> (i32, i32) {
    %c0_i32 = arith.constant 0 : i32
    %c0_i32_0 = arith.constant 0 : i32
    %c0_i32_1 = arith.constant 0 : i32
    return %c0_i32, %c0_i32_0 : i32, i32
  }
  func.func @transform_2(%arg0: i32) -> (i32, i32) {
    %c0_i32 = arith.constant 0 : i32
    %c0_i32_0 = arith.constant 0 : i32
    %c0_i32_1 = arith.constant 0 : i32
    return %c0_i32, %c0_i32_0 : i32, i32
  }
  func.func @transform_3(%arg0: i32) -> (i32, i32) {
    %c0_i32 = arith.constant 0 : i32
    %c0_i32_0 = arith.constant 0 : i32
    return %c0_i32, %arg0 : i32, i32
  }
  func.func @transform_4(%arg0: i32) -> (i32, i32, i32) {
    %c0_i32 = arith.constant 0 : i32
    %c0_i32_0 = arith.constant 0 : i32
    %c0_i32_1 = arith.constant 0 : i32
    %c0_i32_2 = arith.constant 0 : i32
    return %c0_i32, %c0_i32_0, %c0_i32_1 : i32, i32, i32
  }
  func.func @transform_5(%arg0: i32) -> (i32, i32) {
    %c0_i32 = arith.constant 0 : i32
    %c0_i32_0 = arith.constant 0 : i32
    return %c0_i32, %arg0 : i32, i32
  }
}

</mosaic_0001>

<bundles_post_ra>
// kernel: tpu_custom_call.1
= control target key start
LH: loop header
LB: loop body
LE: loop exit
PB: predicated region body
PF: predicated region fallthrough
CT: control target
= control target key end

     0   :  { %vm43_vm0 = vcmask 1043456   ;;  %v658_v3 = vmov 0   ;;  %vm36_vm1 = vcmask 31744   ;;  %v659_v6 = vmov 1   ;;  %s904_s0 = inlined_call_operand.vmem [shape: f32[4,128], index: 0, kind: input, shape index: {}]   ;;  %s905_s1 = inlined_call_operand.vmem [shape: f32[16,4], index: 1, kind: input, shape index: {}]   ;;  %s906_s2 = inlined_call_operand.vmem [shape: f32[16,1], index: 2, kind: input, shape index: {}]   ;;  %s907_s3 = inlined_call_operand.vmem [shape: s32[3,128], index: 3, kind: input, shape index: {}]   ;;  %s908_s4 = inlined_call_operand.vmem [shape: f32[3,16,8], index: 4, kind: input, shape index: {}]   ;;  %s909_s5 = inlined_call_operand.hbm [shape: f32[16,128], index: 5, kind: output, shape index: {}]  }
   0x1   :  { %v23_v0 = vld [vmem:[%s904_s0] sm:$0xf]  ;;  %598 = vset.pattern.permute.xlu1 %v658_v3  ;;  %v22_v4 = vld [vmem:[%s905_s1 + $0x8] sm:$0xff]  ;;  %599 = vset.pattern.permute.xlu0 %v659_v6 }
   0x2   :  { %v123_v1 = vld [vmem:[%s908_s4] sm:$0xff]  ;;  %581 = vmatprep.subr.msk.mxu0 %vm43_vm0, %v23_v0  ;;  %v124_v5 = vld [vmem:[%s908_s4 + $0x8] sm:$0xff] }
   0x3   :  { %v21_v2 = vld [vmem:[%s905_s1] sm:$0xff]  ;;  %134 = vperm.xlu1 %598, %v123_v1   ;;  %582 = vmatpush3.msk.msra.mxu0 %vm43_vm0, %v23_v0 }
   0x4   :  { %583 = vmatprep.mubr.msk.f32.mxu0 %vm36_vm1, %v21_v2  ;;  %154 = vperm.xlu0 %599, %v123_v1  }
   0x5   :  { %584 = vmatmul.mubr.msk.f32.vlgmr.msra.gmra.mrb[0].mxu0 %vm36_vm1, %v22_v4 }
   0x6   :  { %10 = vsyncpa [#allocation3], 0  ;;  %v660_v7 = vmov 4   ;;  %v661_v8 = vmov 7   ;;  %v662_v9 = vmov 2   ;;  %v663_v10 = vmov 3  }
   0x7   :  { %139 = vperm.xlu1 %598, %v124_v5   ;;  %v574_v11 = vld [vmem:[%s908_s4 + $0x10] sm:$0xff]  ;;  %v664_v12 = vmov 5   ;;  %v575_v13 = vld [vmem:[%s908_s4 + $0x18] sm:$0xff]  ;;  %v665_v14 = vmov 6   ;;  %v24_v15 = vld [vmem:[%s906_s2] sm:$0xff]  ;;  %v128_v42 = vlaneseq  ;;  %v666_v50 = vmov 0.0  }
   0x8   :  { %603 = vset.pattern.permute.xlu0 %v660_v7  ;;  %v25_v16 = vld [vmem:[%s906_s2 + $0x8] sm:$0xff]  ;;  %v576_v17 = vld [vmem:[%s908_s4 + $0x20] sm:$0xff] }
   0x9   :  { %211 = vperm.xlu0 %603, %v123_v1   ;;  %v577_v18 = vld [vmem:[%s908_s4 + $0x28] sm:$0xff]  ;;  %v122_v44 = vld [vmem:[%s907_s3] sm:$0x7]  ;;  %v810_v45 = vshrl.u32 %v128_v42, 7  ;;  %s667_s3 = smov [#allocation2]  }
   0xa   :  { %vm125_vm2 = vcmp.eq.s32.totalorder %v122_v44, 0  ;;  %vm146_vm3 = vcmp.eq.s32.totalorder %v122_v44, 1  ;;  %vm165_vm4 = vcmp.eq.s32.totalorder %v122_v44, 2  ;;  %vm184_vm5 = vcmp.eq.s32.totalorder %v122_v44, 3  ;;  %s552_s13 = sshll.u32 %s667_s3, 4  ;;  %s553_s13 = int_to_ptr.vmem [resolvable:$true] %s552_s13 }
   0xb   :  { %600 = vset.pattern.permute.xlu1 %v659_v6  ;;  %v130_v48 = vsub.s32 0, %v810_v45  ;;  %v817_v51 = vsel %vm125_vm2, 1.0, %v666_v50  ;;  %v819_v52 = vsel %vm146_vm3, 1.0, %v666_v50  ;;  %vm203_vm6 = vcmp.eq.s32.totalorder %v122_v44, 4  ;;  %s634_s14 = scalar_lea.vmem %s553_s13, 256  ;;  %p639_p1 = scmp.lt.s32.totalorder %s553_s13, %s553_s13 }
   0xc   :  { %158 = vperm.xlu1 %600, %v124_v5   ;;  %v823_v56 = vsel %vm165_vm4, 1.0, %v666_v50  ;;  %v827_v58 = vsel %vm184_vm5, 1.0, %v666_v50  ;;  %v829_v61 = vsel %vm203_vm6, 1.0, %v666_v50  ;;  %vm222_vm7 = vcmp.eq.s32.totalorder %v122_v44, 5  ;;  %p635_p0 = scmp.ne.s32.totalorder %s553_s13, %s634_s14  ;;  %p640_p2 = scmp.lt.s32.totalorder %s634_s14, %s634_s14 }
   0xd   :  { %607 = vset.pattern.permute.xlu0 %v661_v8  ;;  %v131_v53 = vrot.slane %v817_v51, %v130_v48  ;;  %v152_v55 = vrot.slane %v819_v52, %v130_v48  ;;  %vm241_vm8 = vcmp.eq.s32.totalorder %v122_v44, 6  ;;  %vm260_vm9 = vcmp.eq.s32.totalorder %v122_v44, 7 }
   0xe   :  { %268 = vperm.xlu0 %607, %v123_v1   ;;  %p641_p3 = por %p640_p2, %p639_p1 }
  0x10   :  { %601 = vset.pattern.permute.xlu1 %v662_v9  ;;  %p642_p4 = pnand %p641_p3, %p635_p0 }
  0x11   :  { %173 = vperm.xlu1 %601, %v123_v1  }
  0x12   :  { %608 = vset.pattern.permute.xlu0 %v662_v9 }
  0x13   :  { %177 = vperm.xlu0 %608, %v124_v5  }
  0x15   :  { %602 = vset.pattern.permute.xlu1 %v663_v10 }
  0x16   :  { %192 = vperm.xlu1 %602, %v123_v1  }
  0x17   :  { %321 = vperm.xlu0 %608, %v574_v11  }
  0x1a   :  { %196 = vperm.xlu1 %602, %v124_v5  }
  0x1b   :  { %612 = vset.pattern.permute.xlu0 %v664_v12 }
  0x1c   :  { %234 = vperm.xlu0 %612, %v124_v5  }
  0x1e   :  { %604 = vset.pattern.permute.xlu1 %v660_v7 }
  0x1f   :  { %215 = vperm.xlu1 %604, %v124_v5  }
  0x20   :  { %369 = vperm.xlu0 %612, %v574_v11  }
  0x23   :  { %605 = vset.pattern.permute.xlu1 %v664_v12 }
  0x24   :  { %230 = vperm.xlu1 %605, %v123_v1   ;;  %618 = vset.pattern.permute.xlu0 %v665_v14 }
  0x25   :  { %389 = vperm.xlu0 %618, %v575_v13  }
  0x28   :  { %606 = vset.pattern.permute.xlu1 %v665_v14 }
  0x29   :  { %249 = vperm.xlu1 %606, %v123_v1   ;;  %619 = vset.pattern.permute.xlu0 %v658_v3  ;;  %v171_v1 = vrot.slane %v823_v56, %v130_v48 }
  0x2a   :  { %28 = vperm.xlu0 %619, %v24_v15  }
  0x2d   :  { %253 = vperm.xlu1 %606, %v124_v5  }
  0x2e   :  { %33 = vperm.xlu0 %619, %v25_v16  }
  0x31   :  { %609 = vset.pattern.permute.xlu1 %v661_v8 }
  0x32   :  { %272 = vperm.xlu1 %609, %v124_v5   ;;  %293 = vperm.xlu0 %619, %v575_v13   ;;  %v190_v5 = vrot.slane %v827_v58, %v130_v48 }
  0x36   :  { %610 = vset.pattern.permute.xlu1 %v658_v3  ;;  %421 = vperm.xlu0 %619, %v576_v17  }
  0x37   :  { %288 = vperm.xlu1 %610, %v574_v11  }
  0x3a   :  { %623 = vset.pattern.permute.xlu0 %v659_v6 }
  0x3b   :  { %611 = vset.pattern.permute.xlu1 %v659_v6  ;;  %442 = vperm.xlu0 %623, %v577_v18  }
  0x3c   :  { %305 = vperm.xlu1 %611, %v574_v11  }
  0x3f   :  { %624 = vset.pattern.permute.xlu0 %v663_v10 }
  0x40   :  { %309 = vperm.xlu1 %611, %v575_v13   ;;  %341 = vperm.xlu0 %624, %v575_v13  }
  0x44   :  { %613 = vset.pattern.permute.xlu1 %v662_v9  ;;  %470 = vperm.xlu0 %624, %v576_v17  }
  0x45   :  { %325 = vperm.xlu1 %613, %v575_v13  }
  0x48   :  { %628 = vset.pattern.permute.xlu0 %v660_v7 }
  0x49   :  { %614 = vset.pattern.permute.xlu1 %v663_v10  ;;  %490 = vperm.xlu0 %628, %v577_v18  }
  0x4a   :  { %337 = vperm.xlu1 %614, %v574_v11  }
  0x4d   :  { %630 = vset.pattern.permute.xlu0 %v665_v14 }
  0x4e   :  { %615 = vset.pattern.permute.xlu1 %v660_v7  ;;  %518 = vperm.xlu0 %630, %v576_v17  }
  0x4f   :  { %353 = vperm.xlu1 %615, %v574_v11  }
  0x52   :  { %633 = vset.pattern.permute.xlu0 %v661_v8 }
  0x53   :  { %357 = vperm.xlu1 %615, %v575_v13   ;;  %538 = vperm.xlu0 %633, %v577_v18  }
  0x57   :  { %616 = vset.pattern.permute.xlu1 %v664_v12 }
  0x58   :  { %373 = vperm.xlu1 %616, %v575_v13  }
  0x5c   :  { %617 = vset.pattern.permute.xlu1 %v665_v14 }
  0x5d   :  { %385 = vperm.xlu1 %617, %v574_v11  }
  0x61   :  { %620 = vset.pattern.permute.xlu1 %v661_v8 }
  0x62   :  { %401 = vperm.xlu1 %620, %v574_v11   ;;  %v836_v11 = vsel %vm222_vm7, 1.0, %v666_v50 }
  0x66   :  { %405 = vperm.xlu1 %620, %v575_v13  }
  0x6a   :  { %621 = vset.pattern.permute.xlu1 %v658_v3 }
  0x6b   :  { %426 = vperm.xlu1 %621, %v577_v18  }
  0x6f   :  { %622 = vset.pattern.permute.xlu1 %v659_v6 }
  0x70   :  { %438 = vperm.xlu1 %622, %v576_v17  }
  0x74   :  { %625 = vset.pattern.permute.xlu1 %v662_v9 }
  0x75   :  { %454 = vperm.xlu1 %625, %v576_v17  }
  0x79   :  { %458 = vperm.xlu1 %625, %v577_v18  }
  0x7d   :  { %626 = vset.pattern.permute.xlu1 %v663_v10 }
  0x7e   :  { %474 = vperm.xlu1 %626, %v577_v18  }
  0x82   :  { %627 = vset.pattern.permute.xlu1 %v660_v7  ;;  %v135_v19 = vpop.permute.xlu1 %134  ;;  %v209_v7 = vrot.slane %v829_v61, %v130_v48 }
  0x83   :  { %486 = vperm.xlu1 %627, %v576_v17   ;;  %v155_v26 = vpop.permute.xlu0 %154  ;;  %v142_v0 = vmul.f32 %v135_v19, %v131_v53 }
  0x86   :  { %v140_v20 = vpop.permute.xlu1 %139 }
  0x87   :  { %629 = vset.pattern.permute.xlu1 %v664_v12  ;;  %v143_v60 = vmul.f32 %v140_v20, %v131_v53  ;;  %v228_v20 = vrot.slane %v836_v11, %v130_v48 }
  0x88   :  { %502 = vperm.xlu1 %629, %v576_v17   ;;  %v779_v28 = vpop.permute.xlu0 %211 }
  0x89   :  { %v218_v53 = vmul.f32 %v779_v28, %v209_v7 }
  0x8b   :  { %v159_v21 = vpop.permute.xlu1 %158 }
  0x8c   :  { %506 = vperm.xlu1 %629, %v577_v18   ;;  %v162_v4 = vmul.f32 %v159_v21, %v152_v55  ;;  %v844_v21 = vsel %vm260_vm9, 1.0, %v666_v50 }
  0x8d   :  { %v785_v31 = vpop.permute.xlu0 %268 }
  0x90   :  { %631 = vset.pattern.permute.xlu1 %v665_v14  ;;  %v768_v22 = vpop.permute.xlu1 %173 }
  0x91   :  { %522 = vperm.xlu1 %631, %v577_v18   ;;  %v180_v14 = vmul.f32 %v768_v22, %v171_v1 }
  0x92   :  { %v178_v33 = vpop.permute.xlu0 %177 }
  0x93   :  { %v181_v12 = vmul.f32 %v178_v33, %v171_v1 }
  0x95   :  { %632 = vset.pattern.permute.xlu1 %v661_v8  ;;  %v771_v23 = vpop.permute.xlu1 %192  ;;  %v161_v8 = vmul.f32 %v155_v26, %v152_v55 }
  0x96   :  { %534 = vperm.xlu1 %632, %v576_v17   ;;  %v791_v35 = vpop.permute.xlu0 %321  ;;  %v840_v17 = vsel %vm241_vm8, 1.0, %v666_v50  ;;  %v199_v19 = vmul.f32 %v771_v23, %v190_v5  ;;  %v266_v23 = vrot.slane %v844_v21, %v130_v48 }
  0x97   :  { %v247_v22 = vrot.slane %v840_v17, %v130_v48 }
  0x98   :  { %v275_v48 = vmul.f32 %v785_v31, %v266_v23 }
  0x99   :  { %v773_v24 = vpop.permute.xlu1 %196 }
  0x9a   :  { %v200_v16 = vmul.f32 %v773_v24, %v190_v5  ;;  %v284_v24 = vsub.s32 1, %v810_v45 }
  0x9b   :  { %v795_v37 = vpop.permute.xlu0 %234 }
  0x9c   :  { %v238_v50 = vmul.f32 %v795_v37, %v228_v20  ;;  %v303_v37 = vrot.slane %v819_v52, %v284_v24 }
  0x9e   :  { %v775_v25 = vpop.permute.xlu1 %215 }
  0x9f   :  { %v801_v40 = vpop.permute.xlu0 %369  ;;  %v219_v33 = vmul.f32 %v775_v25, %v209_v7 }
  0xa3   :  { %v777_v27 = vpop.permute.xlu1 %230 }
  0xa4   :  { %v805_v43 = vpop.permute.xlu0 %389 }
  0xa8   :  { %v781_v29 = vpop.permute.xlu1 %249 }
  0xa9   :  { %v29_v47 = vpop.permute.xlu0 %28  ;;  %v256_v1 = vmul.f32 %v781_v29, %v247_v22 }
  0xac   :  { %v783_v30 = vpop.permute.xlu1 %253 }
  0xad   :  { %v34_v54 = vpop.permute.xlu0 %33  ;;  %v257_v25 = vmul.f32 %v783_v30, %v247_v22 }
  0xb1   :  { %v787_v32 = vpop.permute.xlu1 %272  ;;  %v294_v3 = vpop.permute.xlu0 %293 }
  0xb2   :  { %v276_v28 = vmul.f32 %v787_v32, %v266_v23  ;;  %v383_v23 = vrot.slane %v840_v17, %v284_v24 }
  0xb5   :  { %v846_v42 = vpop.permute.xlu0 %421 }
  0xb6   :  { %v789_v34 = vpop.permute.xlu1 %288 }
  0xbb   :  { %v793_v36 = vpop.permute.xlu1 %305 }
  0xbf   :  { %v797_v38 = vpop.permute.xlu1 %309 }
  0xc4   :  { %v799_v39 = vpop.permute.xlu1 %325 }
  0xc9   :  { %v803_v41 = vpop.permute.xlu1 %337 }
  0xce   :  { %v812_v46 = vpop.permute.xlu1 %353 }
  0xd2   :  { %v815_v49 = vpop.permute.xlu1 %357 }
  0xd7   :  { %v825_v57 = vpop.permute.xlu1 %373 }
  0xd8   :  { %v585_v59 = vpop.f32.mrb[0].mxu0 }
  0xd9   :  { %v119_v62 = vadd.f32 %v585_v59, %v34_v54  ;;  %v113_v63 = vpop.f32.mrb[1].mxu0  ;;  %v237_v59 = vmul.f32 %v777_v27, %v228_v20  ;;  %v319_v27 = vrot.slane %v823_v56, %v284_v24 }
  0xda   :  { %v114_v2 = vadd.f32 %v113_v63, %v29_v47 }
  0xdb   :  { %v145_v6 = vadd.f32 %v143_v60, %v119_v62  ;;  %v443_v62 = vpop.permute.xlu0 %442  ;;  %v328_v20 = vmul.f32 %v791_v35, %v319_v27 }
  0xdc   :  { %v144_v9 = vadd.f32 %v142_v0, %v114_v2  ;;  %v834_v10 = vpop.permute.xlu1 %385  ;;  %v285_v2 = vrot.slane %v817_v51, %v284_v24 }
  0xdd   :  { %v164_v13 = vadd.f32 %v162_v4, %v145_v6 }
  0xde   :  { %v163_v15 = vadd.f32 %v161_v8, %v144_v9  ;;  %v297_v8 = vmul.f32 %v294_v3, %v285_v2  ;;  %v296_v30 = vmul.f32 %v789_v34, %v285_v2  ;;  %v351_v3 = vrot.slane %v829_v61, %v284_v24 }
  0xdf   :  { %v183_v18 = vadd.f32 %v181_v12, %v164_v13  ;;  %v342_v29 = vpop.permute.xlu0 %341  ;;  %v313_v13 = vmul.f32 %v797_v38, %v303_v37  ;;  %v367_v38 = vrot.slane %v836_v11, %v284_v24 }
  0xe0   :  { %v182_v26 = vadd.f32 %v180_v14, %v163_v15  ;;  %v335_v14 = vrot.slane %v827_v58, %v284_v24  ;;  %v312_v15 = vmul.f32 %v793_v36, %v303_v37 }
  0xe1   :  { %v202_v44 = vadd.f32 %v200_v16, %v183_v18  ;;  %v849_v47 = vpop.permute.xlu1 %401  ;;  %v329_v16 = vmul.f32 %v799_v39, %v319_v27  ;;  %v377_v35 = vmul.f32 %v825_v57, %v367_v38 }
  0xe2   :  { %v201_v54 = vadd.f32 %v199_v19, %v182_v26  ;;  %v345_v19 = vmul.f32 %v342_v29, %v335_v14 }
  0xe3   :  { %v221_v55 = vadd.f32 %v219_v33, %v202_v44  ;;  %v344_v44 = vmul.f32 %v803_v41, %v335_v14  ;;  %v393_v41 = vmul.f32 %v805_v43, %v383_v23 }
  0xe4   :  { %v220_v60 = vadd.f32 %v218_v53, %v201_v54  ;;  %v361_v53 = vmul.f32 %v815_v49, %v351_v3  ;;  %v360_v54 = vmul.f32 %v812_v46, %v351_v3  ;;  %v417_v49 = vsub.s32 2, %v810_v45 }
  0xe5   :  { %v240_v63 = vadd.f32 %v238_v50, %v221_v55  ;;  %v406_v0 = vpop.permute.xlu1 %405  ;;  %v376_v55 = vmul.f32 %v801_v40, %v367_v38  ;;  %v392_v46 = vmul.f32 %v834_v10, %v383_v23 }
  0xe6   :  { %v239_v4 = vadd.f32 %v237_v59, %v220_v60  ;;  %v418_v57 = vrot.slane %v817_v51, %v417_v49  ;;  %v436_v37 = vrot.slane %v819_v52, %v417_v49  ;;  %v468_v51 = vrot.slane %v827_v58, %v417_v49 }
  0xe7   :  { %v259_v5 = vadd.f32 %v257_v25, %v240_v63 }
  0xe8   :  { %v258_v6 = vadd.f32 %v256_v1, %v239_v4  ;;  %v399_v1 = vrot.slane %v844_v21, %v284_v24  ;;  %v429_v45 = vmul.f32 %v846_v42, %v418_v57 }
  0xe9   :  { %v278_v7 = vadd.f32 %v276_v28, %v259_v5 }
  0xea   :  { %v277_v9 = vadd.f32 %v275_v48, %v258_v6  ;;  %v427_v12 = vpop.permute.xlu1 %426  ;;  %v409_v28 = vmul.f32 %v406_v0, %v399_v1  ;;  %v408_v40 = vmul.f32 %v849_v47, %v399_v1  ;;  %v452_v0 = vrot.slane %v823_v56, %v417_v49 }
  0xeb   :  { %v299_v32 = vadd.f32 %v297_v8, %v278_v7  ;;  %v430_v43 = vmul.f32 %v427_v12, %v418_v57  ;;  %v446_v7 = vmul.f32 %v443_v62, %v436_v37  ;;  %v471_v8 = vpop.permute.xlu0 %470 }
  0xec   :  { %v298_v31 = vadd.f32 %v296_v30, %v277_v9  ;;  %v477_v42 = vmul.f32 %v471_v8, %v468_v51 }
  0xed   :  { %v315_v18 = vadd.f32 %v313_v13, %v299_v32  ;;  %v484_v32 = vrot.slane %v829_v61, %v417_v49 }
  0xee   :  { %v314_v34 = vadd.f32 %v312_v15, %v298_v31 }
  0xef   :  { %v331_v26 = vadd.f32 %v329_v16, %v315_v18  ;;  %v439_v33 = vpop.permute.xlu1 %438  ;;  %v491_v14 = vpop.permute.xlu0 %490  ;;  %v500_v16 = vrot.slane %v836_v11, %v417_v49 }
  0xf0   :  { %v330_v22 = vadd.f32 %v328_v20, %v314_v34  ;;  %v445_v29 = vmul.f32 %v439_v33, %v436_v37  ;;  %v494_v56 = vmul.f32 %v491_v14, %v484_v32  ;;  %v532_v34 = vrot.slane %v844_v21, %v417_v49 }
  0xf1   :  { %v347_v36 = vadd.f32 %v345_v19, %v331_v26 }
  0xf2   :  { %v346_v39 = vadd.f32 %v344_v44, %v330_v22  ;;  %v516_v44 = vrot.slane %v840_v17, %v417_v49 }
  0xf3   :  { %v363_v50 = vadd.f32 %v361_v53, %v347_v36  ;;  %v519_v18 = vpop.permute.xlu0 %518 }
  0xf4   :  { %v362_v59 = vadd.f32 %v360_v54, %v346_v39  ;;  %v455_v60 = vpop.permute.xlu1 %454  ;;  %v525_v23 = vmul.f32 %v519_v18, %v516_v44 }
  0xf5   :  { %v379_v25 = vadd.f32 %v377_v35, %v363_v50  ;;  %v461_v15 = vmul.f32 %v455_v60, %v452_v0 }
  0xf6   :  { %v378_v63 = vadd.f32 %v376_v55, %v362_v59 }
  0xf7   :  { %v395_v2 = vadd.f32 %v393_v41, %v379_v25  ;;  %v539_v38 = vpop.permute.xlu0 %538 }
  0xf8   :  { %v459_v4 = vpop.permute.xlu1 %458  ;;  %v394_v5 = vadd.f32 %v392_v46, %v378_v63  ;;  %v542_v39 = vmul.f32 %v539_v38, %v532_v34 }
  0xf9   :  { %v411_v48 = vadd.f32 %v409_v28, %v395_v2  ;;  %v462_v13 = vmul.f32 %v459_v4, %v452_v0 }
  0xfa   :  { %v410_v27 = vadd.f32 %v408_v40, %v394_v5 }
  0xfb   :  { %v432_v24 = vadd.f32 %v430_v43, %v411_v48 }
  0xfc   :  { %v431_v30 = vadd.f32 %v429_v45, %v410_v27 }
  0xfd   :  { %v475_v6 = vpop.permute.xlu1 %474  ;;  %v448_v9 = vadd.f32 %v446_v7, %v432_v24 }
  0xfe   :  { %v447_v47 = vadd.f32 %v445_v29, %v431_v30  ;;  %v478_v12 = vmul.f32 %v475_v6, %v468_v51 }
  0xff   :  { %v464_v52 = vadd.f32 %v462_v13, %v448_v9 }
 0x100   :  { %v463_v31 = vadd.f32 %v461_v15, %v447_v47 }
 0x101   :  { %v480_v19 = vadd.f32 %v478_v12, %v464_v52 }
 0x102   :  { %v487_v10 = vpop.permute.xlu1 %486  ;;  %v479_v26 = vadd.f32 %v477_v42, %v463_v31 }
 0x103   :  { %v493_v3 = vmul.f32 %v487_v10, %v484_v32  ;;  %v496_v61 = vadd.f32 %v494_v56, %v480_v19 }
 0x105   :  { %v495_v22 = vadd.f32 %v493_v3, %v479_v26 }
 0x107   :  { %v503_v62 = vpop.permute.xlu1 %502 }
 0x108   :  { %v509_v33 = vmul.f32 %v503_v62, %v500_v16 }
 0x10a   :  { %v511_v11 = vadd.f32 %v509_v33, %v495_v22 }
 0x10b   :  { %v507_v20 = vpop.permute.xlu1 %506 }
 0x10c   :  { %v510_v58 = vmul.f32 %v507_v20, %v500_v16  ;;  %v527_v59 = vadd.f32 %v525_v23, %v511_v11 }
 0x10e   :  { %v512_v36 = vadd.f32 %v510_v58, %v496_v61 }
 0x110   :  { %v523_v53 = vpop.permute.xlu1 %522 }
 0x111   :  { %v526_v54 = vmul.f32 %v523_v53, %v516_v44 }
 0x113   :  { %v528_v35 = vadd.f32 %v526_v54, %v512_v36 }
 0x115   :  { %v544_v50 = vadd.f32 %v542_v39, %v528_v35  ;;  %v535_v55 = vpop.permute.xlu1 %534 }
 0x116   :  { %v541_v21 = vmul.f32 %v535_v55, %v532_v34 }
 0x117   :  { %546 = vst [vmem:[#allocation2 + $0x8] sm:$0xff] %v544_v50 }
 0x118   :  { %v543_v60 = vadd.f32 %v541_v21, %v527_v59 }
 0x11a   :  { %545 = vst [vmem:[#allocation2] sm:$0xff] %v543_v60 }
 0x11b   :  { %645 = shalt.err (!%p642_p4)
}
 0x11c   :  { %s646_s17 = scalar_lea.hbm %s909_s5, 256 }
 0x11d   :  { %p647_p5 = scmp.ne.s32.totalorder %s909_s5, %s646_s17  ;;  %p650_p6 = scmp.lt.u32.totalorder %s646_s17, %s909_s5 }
 0x11f   :  { %p652_p7 = pnand %p650_p6, %p647_p5 }
 0x121   :  { %655 = shalt.err (!%p652_p7)
}
 0x122   :  { %s668_s22 = smov 128   ;;  %s669_s23 = smov 8  }
 0x123   :  { %558 = dma.vmem_to_hbm [thread:$0]  %s553_s13, 256, %s909_s5, [#allocation3], %s668_s22, %s668_s22, %s669_s23  }
 0x124   :  { %656 = dma.done.wait [#allocation3], 256  }
 0x125   :  { %657 = vsyncadd [#allocation3], 4294967040 }
 0x126   :  { %562 = vsyncpa [#allocation3], 1 }

</bundles_post_ra>
